<compile_context>
chip_gen: v7x
topology: tpu7x:2x2x1
jax: 0.10.0
libtpu: 0.0.40
codegen_flags: <defaults>
</compile_context>

<pallas_src>
import jax
import jax.numpy as jnp
from jax.experimental import pallas as pl
from jax.experimental.pallas import tpu as pltpu


def mlp_kernel(x_ref, w1_ref, b1_ref, w2_ref, b2_ref,
               w3_ref, b3_ref, w4_ref, b4_ref, o_ref):
    bf16 = jnp.bfloat16
    # x streamed f32 from HBM; cast to bf16 in-register (saves a whole wrapper
    # side HBM read+write pass over x).
    x = x_ref[...].astype(bf16)                                      # (bm, D)
    h = jnp.dot(x, w1_ref[...].astype(bf16),
                preferred_element_type=jnp.float32) + b1_ref[...]
    h = jnp.maximum(h, 0.0).astype(bf16)                             # (bm, 64)
    h = jnp.dot(h, w2_ref[...].astype(bf16),
                preferred_element_type=jnp.float32) + b2_ref[...]
    h = jnp.maximum(h, 0.0).astype(bf16)                             # (bm, 32)
    h = jnp.dot(h, w3_ref[...].astype(bf16),
                preferred_element_type=jnp.float32) + b3_ref[...]
    h = jnp.maximum(h, 0.0).astype(bf16)                             # (bm, 16)
    # Final 16 -> 1 layer as (1,16) . (bm,16)^T -> (1, bm): lane-dense output
    # row instead of a (bm, 1) masked store.
    # TODO(synk): verify via bundle dump that Mosaic lowers the h-transpose to
    # an XLU vxpose (free slot) rather than a VMEM copy; if it copies,
    # restructure to the (bm,1) matmul + repack and re-measure.
    o = jax.lax.dot_general(
        w4_ref[...].astype(bf16), h,
        dimension_numbers=(((1,), (1,)), ((), ())),
        preferred_element_type=jnp.float32)                          # (1, bm)
    o = o + b4_ref[...]                                              # + (1,1) bias
    o_ref[...] = o[None].astype(o_ref.dtype)                         # (1, 1, bm)


# Minimum 128 keeps the output lane-dense; 4096/8192 amortize per-step
# overhead on large batches (VMEM-budget gated below).
_TILE_CANDIDATES = (8192, 4096, 2048, 1024, 512, 256, 128)
_TILE_VMEM_BUDGET = 26 * 1024 * 1024   # headroom under v7x's 64 MiB/TC


def _tensorcores_per_chip():
    """v7x is the only targeted gen with 2 TensorCores per chip."""
    try:
        kind = jax.devices()[0].device_kind.lower()
    except Exception:
        return 1
    return 2 if "v7" in kind else 1


def _tile_vmem_bytes(t, D, bufs):
    lanes = max(128, D)
    x_bytes = bufs * t * lanes * 4        # streamed f32 x tiles (multi-buffered)
    act_bytes = 4 * t * 128 * 4           # h1..h3 (+ transpose temp), f32, lane-padded
    out_bytes = bufs * t * 4              # (1, 1, t) f32 output rows
    return x_bytes + act_bytes + out_bytes


def _pick_block_batch(B, D, cores, bufs):
    """Largest tile that (a) gives every TensorCore a full tile and (b) fits VMEM."""
    for t in _TILE_CANDIDATES:
        if _tile_vmem_bytes(t, D, bufs) > _TILE_VMEM_BUDGET:
            continue
        if B >= cores * t:
            return t
    return _TILE_CANDIDATES[-1]           # tiny batch: one (or `cores`) 128-row tile(s)


def _vmem_limit_bytes(block_batch, D, bufs):
    est = _tile_vmem_bytes(block_batch, D, bufs) + 6 * 1024 * 1024  # weights + scratch
    # Raise above the 16/32 MiB scoped defaults, stay well under v7x's 64 MiB.
    return int(min(max(est, 32 * 1024 * 1024), 50 * 1024 * 1024))


def delay_predictor_forward(x, params, *, block_batch=None, x_buffer_count=2):
    """x: (B, input_dim) float32.  params: dict (w1..w3 stored (in,out), w4 (1,16))."""
    B, D = x.shape
    cores = _tensorcores_per_chip()
    bufs = max(2, int(x_buffer_count))
    if block_batch is None:
        block_batch = _pick_block_batch(B, D, cores, bufs)
    if block_batch % 128 != 0:
        raise ValueError("block_batch must be a multiple of 128 (lane-dense output)")

    # Tiles that touch real rows (last one may be partial -> Pallas pads the read).
    num_x_tiles = pl.cdiv(B, block_batch)
    # On v7x, round the grid up to a multiple of the core count so the
    # "parallel" axis shards evenly across both TensorCores.
    num_tiles = num_x_tiles
    if cores > 1 and num_tiles % cores:
        num_tiles += cores - (num_tiles % cores)

    if num_tiles == num_x_tiles:
        x_index = lambda i: (i, 0)
    else:
        # Balancing tiles re-read the last real block (always in-bounds);
        # their output rows are discarded by the wrapper.
        last = num_x_tiles - 1
        x_index = lambda i, _last=last: (jnp.minimum(i, _last), 0)

    x_spec_kwargs = {}
    if bufs != 2:
        # Optional deeper pipeline on the only streamed operand (use if xprof
        # shows exposed per-step DMA latency for tiny input_dim).
        x_spec_kwargs["pipeline_mode"] = pl.Buffered(bufs)
    x_spec = pl.BlockSpec((block_batch, D), x_index, **x_spec_kwargs)

    w1, w2, w3, w4 = (params[k] for k in ("w1", "w2", "w3", "w4"))
    b1, b2, b3, b4 = (params[k].astype(jnp.float32) for k in ("b1", "b2", "b3", "b4"))

    def rep(shape):
        # replicated operand: constant block index => loaded once, no re-DMA
        nd = len(shape)
        return pl.BlockSpec(shape, lambda i, _nd=nd: (0,) * _nd)

    out = pl.pallas_call(
        mlp_kernel,
        out_shape=jax.ShapeDtypeStruct((num_tiles, 1, block_batch), jnp.float32),
        grid_spec=pltpu.PrefetchScalarGridSpec(
            num_scalar_prefetch=0,
            grid=(num_tiles,),
            in_specs=[
                x_spec,                              # x tile over batch (f32 stream)
                rep(w1.shape), rep(b1.shape),
                rep(w2.shape), rep(b2.shape),
                rep(w3.shape), rep(b3.shape),
                rep(w4.shape), rep(b4.shape),
            ],
            out_specs=pl.BlockSpec((1, 1, block_batch), lambda i: (i, 0, 0)),
        ),
        compiler_params=pltpu.CompilerParams(
            dimension_semantics=("parallel",),       # shards batch tiles across TCs on v7x
            vmem_limit_bytes=_vmem_limit_bytes(block_batch, D, bufs),
        ),
    )(x, w1, b1, w2, b2, w3, b3, w4, b4)

    # (num_tiles, 1, block_batch) -> (num_tiles*block_batch, 1), drop padded rows.
    return out.reshape(num_tiles * block_batch, 1)[:B]


def init_params(key, input_dim):
    """Deterministic synthetic init mirroring nn.Linear (w1..w3 stored (in,out),
    out_delay weight kept in its native (out,in)=(1,16) layout)."""
    ks = jax.random.split(key, 8)

    def linear(kw, kb, fan_in, fan_out, *, w_shape=None):
        bound = 1.0 / jnp.sqrt(fan_in)
        shape = (fan_in, fan_out) if w_shape is None else w_shape
        w = jax.random.uniform(kw, shape, jnp.float32, -bound, bound)
        b = jax.random.uniform(kb, (1, fan_out), jnp.float32, -bound, bound)
        return w, b

    w1, b1 = linear(ks[0], ks[1], input_dim, 64)
    w2, b2 = linear(ks[2], ks[3], 64, 32)
    w3, b3 = linear(ks[4], ks[5], 32, 16)
    w4, b4 = linear(ks[6], ks[7], 16, 1, w_shape=(1, 16))
    return dict(w1=w1, b1=b1, w2=w2, b2=b2, w3=w3, b3=b3, w4=w4, b4=b4)


def reference_forward(x, p):
    """bf16-matmul / f32-accumulate reference matching the kernel's numerics.
    (The true torch module is pure f32; bf16 matmul error is ~1e-2 relative at
    worst for these widths, which is acceptable for this regression test.)"""
    bf, f32 = jnp.bfloat16, jnp.float32
    h = x.astype(bf)
    h = jnp.maximum(jnp.dot(h, p["w1"].astype(bf), preferred_element_type=f32) + p["b1"], 0.0)
    h = jnp.maximum(jnp.dot(h.astype(bf), p["w2"].astype(bf), preferred_element_type=f32) + p["b2"], 0.0)
    h = jnp.maximum(jnp.dot(h.astype(bf), p["w3"].astype(bf), preferred_element_type=f32) + p["b3"], 0.0)
    return jnp.dot(h.astype(bf), p["w4"].astype(bf).T, preferred_element_type=f32) + p["b4"]


if __name__ == "__main__":
    key = jax.random.PRNGKey(0)
    k_x, k_p = jax.random.split(key)

    batch, input_dim = 8, 32
    x = jax.random.normal(k_x, (batch, input_dim), jnp.float32)
    params = init_params(k_p, input_dim)

    out = delay_predictor_forward(x, params)
    out = jax.block_until_ready(out)

    ref = reference_forward(x, params)
    assert out.shape == (batch, 1)
    assert jnp.allclose(out, ref, atol=1e-3, rtol=1e-3), "mismatch vs JAX reference"

    print("KERNEL_OK")
</pallas_src>

<mosaic_0001>
module attributes {stable_mosaic.version = 11 : i64} {
  func.func @mlp_kernel(%arg0: i32, %arg1: memref<128x32xf32, #tpu.memory_space<vmem>>, %arg2: memref<32x64xf32, #tpu.memory_space<vmem>>, %arg3: memref<1x64xf32, #tpu.memory_space<vmem>>, %arg4: memref<64x32xf32, #tpu.memory_space<vmem>>, %arg5: memref<1x32xf32, #tpu.memory_space<vmem>>, %arg6: memref<32x16xf32, #tpu.memory_space<vmem>>, %arg7: memref<1x16xf32, #tpu.memory_space<vmem>>, %arg8: memref<1x16xf32, #tpu.memory_space<vmem>>, %arg9: memref<1x1xf32, #tpu.memory_space<vmem>>, %arg10: memref<1x1x128xf32, #tpu.memory_space<vmem>>) attributes {dimension_semantics = [#tpu.dimension_semantics<parallel>], iteration_bounds = array<i64: 1>, scalar_prefetch = 0 : i64, scratch_operands = 0 : i64, tpu.core_type = #tpu.core_type<tc>, window_params = [{transform_indices = @transform_0, window_bounds = array<i64: 128, 32>}, {pipeline_mode = #tpu.pipeline_mode<synchronous>, transform_indices = @transform_1, window_bounds = array<i64: 32, 64>}, {pipeline_mode = #tpu.pipeline_mode<synchronous>, transform_indices = @transform_2, window_bounds = array<i64: 1, 64>}, {pipeline_mode = #tpu.pipeline_mode<synchronous>, transform_indices = @transform_3, window_bounds = array<i64: 64, 32>}, {pipeline_mode = #tpu.pipeline_mode<synchronous>, transform_indices = @transform_4, window_bounds = array<i64: 1, 32>}, {pipeline_mode = #tpu.pipeline_mode<synchronous>, transform_indices = @transform_5, window_bounds = array<i64: 32, 16>}, {pipeline_mode = #tpu.pipeline_mode<synchronous>, transform_indices = @transform_6, window_bounds = array<i64: 1, 16>}, {pipeline_mode = #tpu.pipeline_mode<synchronous>, transform_indices = @transform_7, window_bounds = array<i64: 1, 16>}, {pipeline_mode = #tpu.pipeline_mode<synchronous>, transform_indices = @transform_8, window_bounds = array<i64: 1, 1>}, {transform_indices = @transform_9, window_bounds = array<i64: 1, 1, 128>}]} {
    %c0 = arith.constant 0 : index
    %c0_0 = arith.constant 0 : index
    %0 = vector.load %arg1[%c0, %c0_0] : memref<128x32xf32, #tpu.memory_space<vmem>>, vector<128x32xf32>
    %1 = arith.truncf %0 : vector<128x32xf32> to vector<128x32xbf16>
    %c0_1 = arith.constant 0 : index
    %c0_2 = arith.constant 0 : index
    %2 = vector.load %arg2[%c0_1, %c0_2] : memref<32x64xf32, #tpu.memory_space<vmem>>, vector<32x64xf32>
    %3 = arith.truncf %2 : vector<32x64xf32> to vector<32x64xbf16>
    %cst = arith.constant dense<0.000000e+00> : vector<128x64xf32>
    %4 = tpu.matmul %1, %3, %cst {dimension_numbers = #tpu.dot_dimension_numbers<[1], [0], [0], [1], [0, 0, 1, 1], [], []>} : vector<128x32xbf16>, vector<32x64xbf16>, vector<128x64xf32> -> vector<128x64xf32>
    %c0_3 = arith.constant 0 : index
    %c0_4 = arith.constant 0 : index
    %5 = vector.load %arg3[%c0_3, %c0_4] : memref<1x64xf32, #tpu.memory_space<vmem>>, vector<1x64xf32>
    %6 = vector.broadcast %5 : vector<1x64xf32> to vector<128x64xf32>
    %7 = arith.addf %4, %6 : vector<128x64xf32>
    %cst_5 = arith.constant 0.000000e+00 : f32
    %8 = vector.broadcast %cst_5 : f32 to vector<128x64xf32>
    %9 = arith.maximumf %7, %8 : vector<128x64xf32>
    %10 = arith.truncf %9 : vector<128x64xf32> to vector<128x64xbf16>
    %c0_6 = arith.constant 0 : index
    %c0_7 = arith.constant 0 : index
    %11 = vector.load %arg4[%c0_6, %c0_7] : memref<64x32xf32, #tpu.memory_space<vmem>>, vector<64x32xf32>
    %12 = arith.truncf %11 : vector<64x32xf32> to vector<64x32xbf16>
    %cst_8 = arith.constant dense<0.000000e+00> : vector<128x32xf32>
    %13 = tpu.matmul %10, %12, %cst_8 {dimension_numbers = #tpu.dot_dimension_numbers<[1], [0], [0], [1], [0, 0, 1, 1], [], []>} : vector<128x64xbf16>, vector<64x32xbf16>, vector<128x32xf32> -> vector<128x32xf32>
    %c0_9 = arith.constant 0 : index
    %c0_10 = arith.constant 0 : index
    %14 = vector.load %arg5[%c0_9, %c0_10] : memref<1x32xf32, #tpu.memory_space<vmem>>, vector<1x32xf32>
    %15 = vector.broadcast %14 : vector<1x32xf32> to vector<128x32xf32>
    %16 = arith.addf %13, %15 : vector<128x32xf32>
    %cst_11 = arith.constant 0.000000e+00 : f32
    %17 = vector.broadcast %cst_11 : f32 to vector<128x32xf32>
    %18 = arith.maximumf %16, %17 : vector<128x32xf32>
    %19 = arith.truncf %18 : vector<128x32xf32> to vector<128x32xbf16>
    %c0_12 = arith.constant 0 : index
    %c0_13 = arith.constant 0 : index
    %20 = vector.load %arg6[%c0_12, %c0_13] : memref<32x16xf32, #tpu.memory_space<vmem>>, vector<32x16xf32>
    %21 = arith.truncf %20 : vector<32x16xf32> to vector<32x16xbf16>
    %cst_14 = arith.constant dense<0.000000e+00> : vector<128x16xf32>
    %22 = tpu.matmul %19, %21, %cst_14 {dimension_numbers = #tpu.dot_dimension_numbers<[1], [0], [0], [1], [0, 0, 1, 1], [], []>} : vector<128x32xbf16>, vector<32x16xbf16>, vector<128x16xf32> -> vector<128x16xf32>
    %c0_15 = arith.constant 0 : index
    %c0_16 = arith.constant 0 : index
    %23 = vector.load %arg7[%c0_15, %c0_16] : memref<1x16xf32, #tpu.memory_space<vmem>>, vector<1x16xf32>
    %24 = vector.broadcast %23 : vector<1x16xf32> to vector<128x16xf32>
    %25 = arith.addf %22, %24 : vector<128x16xf32>
    %cst_17 = arith.constant 0.000000e+00 : f32
    %26 = vector.broadcast %cst_17 : f32 to vector<128x16xf32>
    %27 = arith.maximumf %25, %26 : vector<128x16xf32>
    %28 = arith.truncf %27 : vector<128x16xf32> to vector<128x16xbf16>
    %c0_18 = arith.constant 0 : index
    %c0_19 = arith.constant 0 : index
    %29 = vector.load %arg8[%c0_18, %c0_19] : memref<1x16xf32, #tpu.memory_space<vmem>>, vector<1x16xf32>
    %30 = arith.truncf %29 : vector<1x16xf32> to vector<1x16xbf16>
    %cst_20 = arith.constant dense<0.000000e+00> : vector<1x128xf32>
    %31 = tpu.matmul %30, %28, %cst_20 {dimension_numbers = #tpu.dot_dimension_numbers<[1], [1], [0], [0], [0, 0, 1, 0], [], []>} : vector<1x16xbf16>, vector<128x16xbf16>, vector<1x128xf32> -> vector<1x128xf32>
    %c0_21 = arith.constant 0 : index
    %c0_22 = arith.constant 0 : index
    %32 = vector.load %arg9[%c0_21, %c0_22] : memref<1x1xf32, #tpu.memory_space<vmem>>, vector<1x1xf32>
    %33 = vector.broadcast %32 : vector<1x1xf32> to vector<1x128xf32>
    %34 = arith.addf %31, %33 : vector<1x128xf32>
    %35 = vector.shape_cast %34 : vector<1x128xf32> to vector<1x1x128xf32>
    %c0_23 = arith.constant 0 : index
    %c0_24 = arith.constant 0 : index
    %c0_25 = arith.constant 0 : index
    %36 = vector.load %arg10[%c0_23, %c0_24, %c0_25] : memref<1x1x128xf32, #tpu.memory_space<vmem>>, vector<1x1x128xf32>
    tpu.vector_store %arg10[%c0_23, %c0_24, %c0_25], %35 {strides = array<i32>} : memref<1x1x128xf32, #tpu.memory_space<vmem>>, vector<1x1x128xf32>,
    return
  }
  func.func @transform_0(%arg0: i32) -> (i32, i32) {
    %c0_i32 = arith.constant 0 : i32
    %c0_i32_0 = arith.constant 0 : i32
    return %arg0, %c0_i32 : i32, i32
  }
  func.func @transform_1(%arg0: i32) -> (i32, i32) {
    %c0_i32 = arith.constant 0 : i32
    %c0_i32_0 = arith.constant 0 : i32
    %c0_i32_1 = arith.constant 0 : i32
    return %c0_i32, %c0_i32_0 : i32, i32
  }
  func.func @transform_2(%arg0: i32) -> (i32, i32) {
    %c0_i32 = arith.constant 0 : i32
    %c0_i32_0 = arith.constant 0 : i32
    %c0_i32_1 = arith.constant 0 : i32
    return %c0_i32, %c0_i32_0 : i32, i32
  }
  func.func @transform_3(%arg0: i32) -> (i32, i32) {
    %c0_i32 = arith.constant 0 : i32
    %c0_i32_0 = arith.constant 0 : i32
    %c0_i32_1 = arith.constant 0 : i32
    return %c0_i32, %c0_i32_0 : i32, i32
  }
  func.func @transform_4(%arg0: i32) -> (i32, i32) {
    %c0_i32 = arith.constant 0 : i32
    %c0_i32_0 = arith.constant 0 : i32
    %c0_i32_1 = arith.constant 0 : i32
    return %c0_i32, %c0_i32_0 : i32, i32
  }
  func.func @transform_5(%arg0: i32) -> (i32, i32) {
    %c0_i32 = arith.constant 0 : i32
    %c0_i32_0 = arith.constant 0 : i32
    %c0_i32_1 = arith.constant 0 : i32
    return %c0_i32, %c0_i32_0 : i32, i32
  }
  func.func @transform_6(%arg0: i32) -> (i32, i32) {
    %c0_i32 = arith.constant 0 : i32
    %c0_i32_0 = arith.constant 0 : i32
    %c0_i32_1 = arith.constant 0 : i32
    return %c0_i32, %c0_i32_0 : i32, i32
  }
  func.func @transform_7(%arg0: i32) -> (i32, i32) {
    %c0_i32 = arith.constant 0 : i32
    %c0_i32_0 = arith.constant 0 : i32
    %c0_i32_1 = arith.constant 0 : i32
    return %c0_i32, %c0_i32_0 : i32, i32
  }
  func.func @transform_8(%arg0: i32) -> (i32, i32) {
    %c0_i32 = arith.constant 0 : i32
    %c0_i32_0 = arith.constant 0 : i32
    %c0_i32_1 = arith.constant 0 : i32
    return %c0_i32, %c0_i32_0 : i32, i32
  }
  func.func @transform_9(%arg0: i32) -> (i32, i32, i32) {
    %c0_i32 = arith.constant 0 : i32
    %c0_i32_0 = arith.constant 0 : i32
    %c0_i32_1 = arith.constant 0 : i32
    return %arg0, %c0_i32, %c0_i32_0 : i32, i32, i32
  }
}

</mosaic_0001>

<bundles_post_ra>
// kernel: tpu_custom_call.1
= control target key start
LH: loop header
LB: loop body
LE: loop exit
PB: predicated region body
PF: predicated region fallthrough
CT: control target
= control target key end

     0   :  { %s1038_s0 = inlined_call_operand.vmem [shape: f32[8,32], index: 0, kind: input, shape index: {}]   ;;  %s1039_s1 = inlined_call_operand.vmem [shape: f32[32,64], index: 1, kind: input, shape index: {}]   ;;  %s1040_s2 = inlined_call_operand.vmem [shape: f32[1,64], index: 2, kind: input, shape index: {}]   ;;  %s1041_s3 = inlined_call_operand.vmem [shape: f32[64,32], index: 3, kind: input, shape index: {}]   ;;  %s1042_s4 = inlined_call_operand.vmem [shape: f32[1,32], index: 4, kind: input, shape index: {}]   ;;  %s1043_s5 = inlined_call_operand.vmem [shape: f32[32,16], index: 5, kind: input, shape index: {}]   ;;  %s1044_s6 = inlined_call_operand.vmem [shape: f32[1,16], index: 6, kind: input, shape index: {}]   ;;  %s1045_s7 = inlined_call_operand.vmem [shape: f32[1,16], index: 7, kind: input, shape index: {}]   ;;  %s1046_s8 = inlined_call_operand.<no memory space> [shape: f32[1,1], index: 8, kind: input, shape index: {}]   ;;  %s1047_s9 = inlined_call_operand.hbm [shape: f32[1,1,128], index: 9, kind: output, shape index: {}]  }
   0x1   :  { %v14_v0 = vstv %s1046_s8 }
   0x2   :  { %15 = vst [vmem:[#allocation2] sm:$0x1] %v14_v0 }
   0x3   :  { %v60_v1 = vld [vmem:[%s1039_s1] sm:$0xff]  ;;  %v61_v2 = vld [vmem:[%s1039_s1 + $0x8] sm:$0xff]  ;;  %v62_v3 = vld [vmem:[%s1039_s1 + $0x10] sm:$0xff]  ;;  %vm73_vm0 = vcmask 261120  }
   0x4   :  { %v64_v4 = vpack.c.bf16 %v61_v2, %v60_v1  ;;  %v63_v5 = vld [vmem:[%s1039_s1 + $0x18] sm:$0xff]  ;;  %v36_v6 = vld [vmem:[%s1038_s0] sm:$0xff]  ;;  %v37_v7 = vld [vmem:[%s1038_s0 + $0x8] sm:$0xff] }
   0x5   :  { %v65_v8 = vpack.c.bf16 %v63_v5, %v62_v3  ;;  %v52_v9 = vpack.c.bf16 %v37_v7, %v36_v6  ;;  %v38_v10 = vld [vmem:[%s1038_s0 + $0x10] sm:$0xff]  ;;  %v39_v11 = vld [vmem:[%s1038_s0 + $0x18] sm:$0xff]  ;;  %v40_v12 = vld [vmem:[%s1038_s0 + $0x20] sm:$0xff] }
   0x6   :  { %706 = vmatprep.subr.bf16.mxu0 %v64_v4  ;;  %v41_v13 = vld [vmem:[%s1038_s0 + $0x28] sm:$0xff]  ;;  %v219_v14 = vld [vmem:[%s1041_s3] sm:$0xff]  ;;  %v53_v15 = vpack.c.bf16 %v39_v11, %v38_v10  ;;  %v221_v17 = vld [vmem:[%s1041_s3 + $0x10] sm:$0xff] }
   0x7   :  { %707 = vmatpush3.bf16.msra.mxu0 %v64_v4  ;;  %710 = vmatprep.mubr.msk.bf16.mxu0 %vm73_vm0, %v52_v9  ;;  %v220_v16 = vld [vmem:[%s1041_s3 + $0x8] sm:$0xff]  ;;  %v222_v18 = vld [vmem:[%s1041_s3 + $0x18] sm:$0xff]  ;;  %v54_v19 = vpack.c.bf16 %v41_v13, %v40_v12 }
   0x8   :  { %708 = vmatprep.subr.bf16.mxu0 %v65_v8  ;;  %v227_v20 = vpack.c.bf16 %v220_v16, %v219_v14  ;;  %v228_v21 = vpack.c.bf16 %v222_v18, %v221_v17 }
   0xb   :  { %709 = vmatpush3.bf16.msra.mxu0 %v65_v8 }
   0xc   :  { %16 = vsyncpa [#allocation4], 0  ;;  %726 = vmatprep.subr.bf16.mxu1 %v227_v20  ;;  %v42_v22 = vld [vmem:[%s1038_s0 + $0x30] sm:$0xff]  ;;  %v43_v23 = vld [vmem:[%s1038_s0 + $0x38] sm:$0xff]  ;;  %vm238_vm1 = vcmask 523264   ;;  %vm820_vm2 = vmmov 0  }
   0xd   :  { %727 = vmatpush3.bf16.msra.mxu1 %v227_v20  ;;  %v44_v24 = vld [vmem:[%s1038_s0 + $0x40] sm:$0xff]  ;;  %v45_v25 = vld [vmem:[%s1038_s0 + $0x48] sm:$0xff]  ;;  %v55_v26 = vpack.c.bf16 %v43_v23, %v42_v22  ;;  %v46_v28 = vld [vmem:[%s1038_s0 + $0x50] sm:$0xff]  ;;  %vm554_vm3 = vcmask 130048   ;;  %s822_s29 = smov [#allocation3]  }
   0xe   :  { %711 = vmatmul.mubr.msk.bf16.vlgmr.msra.gmra.mrb[0].mxu0 %vm73_vm0, %v53_v15  ;;  %728 = vmatprep.subr.bf16.mxu1 %v228_v21  ;;  %v56_v27 = vpack.c.bf16 %v45_v25, %v44_v24  ;;  %v47_v29 = vld [vmem:[%s1038_s0 + $0x58] sm:$0xff]  ;;  %v48_v30 = vld [vmem:[%s1038_s0 + $0x60] sm:$0xff]  ;;  %v49_v31 = vld [vmem:[%s1038_s0 + $0x68] sm:$0xff]  ;;  %s629_s30 = sshll.u32 %s822_s29, 4  ;;  %s630_s30 = int_to_ptr.vmem [resolvable:$true] %s629_s30 }
   0xf   :  { %714 = vmatprep.mubr.msk.bf16.mxu0 %vm73_vm0, %v54_v19  ;;  %v57_v32 = vpack.c.bf16 %v47_v29, %v46_v28  ;;  %v58_v33 = vpack.c.bf16 %v49_v31, %v48_v30  ;;  %v50_v34 = vld [vmem:[%s1038_s0 + $0x70] sm:$0xff]  ;;  %v51_v35 = vld [vmem:[%s1038_s0 + $0x78] sm:$0xff]  ;;  %v223_v37 = vld [vmem:[%s1041_s3 + $0x20] sm:$0xff]  ;;  %s795_s10 = scalar_lea.vmem %s630_s30, 16  ;;  %p800_p1 = scmp.lt.s32.totalorder %s630_s30, %s630_s30 }
  0x10   :  { %v59_v36 = vpack.c.bf16 %v51_v35, %v50_v34  ;;  %v224_v38 = vld [vmem:[%s1041_s3 + $0x28] sm:$0xff]  ;;  %v225_v40 = vld [vmem:[%s1041_s3 + $0x30] sm:$0xff]  ;;  %v226_v41 = vld [vmem:[%s1041_s3 + $0x38] sm:$0xff]  ;;  %p796_p0 = scmp.ne.s32.totalorder %s630_s30, %s795_s10 }
  0x11   :  { %729 = vmatpush3.bf16.msra.mxu1 %v228_v21  ;;  %v229_v39 = vpack.c.bf16 %v224_v38, %v223_v37  ;;  %v230_v42 = vpack.c.bf16 %v226_v41, %v225_v40  ;;  %v384_v43 = vld [vmem:[%s1043_s5] sm:$0xff]  ;;  %v385_v44 = vld [vmem:[%s1043_s5 + $0x8] sm:$0xff]  ;;  %v386_v45 = vld [vmem:[%s1043_s5 + $0x10] sm:$0xff] }
  0x12   :  { %v388_v46 = vpack.c.bf16 %v385_v44, %v384_v43  ;;  %v387_v47 = vld [vmem:[%s1043_s5 + $0x18] sm:$0xff]  ;;  %v637_v49 = vld [vmem:[%s1040_s2] ss:$0 sm:$0xff] }
  0x13   :  { %730 = vmatprep.subr.bf16.mxu1 %v229_v39  ;;  %v389_v48 = vpack.c.bf16 %v387_v47, %v386_v45 }
  0x14   :  { %750 = vmatprep.subr.bf16.mxu0 %v388_v46 }
  0x15   :  { %731 = vmatpush3.bf16.msra.mxu1 %v229_v39  ;;  %751 = vmatpush3.bf16.msra.mxu0 %v388_v46 }
  0x16   :  { %715 = vmatmul.mubr.msk.bf16.gmra.mrb[4].mxu0 %vm73_vm0, %v55_v26  ;;  %732 = vmatprep.subr.bf16.mxu1 %v230_v42 }
  0x17   :  { %718 = vmatprep.mubr.msk.bf16.mxu0 %vm73_vm0, %v56_v27  ;;  %752 = vmatprep.subr.bf16.mxu0 %v389_v48 }
  0x19   :  { %733 = vmatpush3.bf16.msra.mxu1 %v230_v42  ;;  %753 = vmatpush3.bf16.msra.mxu0 %v389_v48  ;;  %v646_v42 = vld [vmem:[%s1042_s4] ss:$0 sm:$0xff] }
  0x1e   :  { %719 = vmatmul.mubr.msk.bf16.gmra.mrb[8].mxu0 %vm73_vm0, %v57_v32 }
  0x1f   :  { %722 = vmatprep.mubr.msk.bf16.mxu0 %vm73_vm0, %v58_v33 }
  0x26   :  { %723 = vmatmul.mubr.msk.bf16.gmra.mrb[12].mxu0 %vm73_vm0, %v59_v36 }
  0xe1   :  { %v712_v50 = vpop.f32.mrb[0].mxu0 }
  0xe2   :  { %v141_v51 = vadd.f32 %v712_v50, %v637_v49  ;;  %v132_v52 = vpop.f32.mrb[1].mxu0 }
  0xe3   :  { %v133_v53 = vadd.f32 %v637_v49, %v132_v52  ;;  %v713_v54 = vpop.f32.mrb[2].mxu0 }
  0xe4   :  { %v144_v55 = vadd.f32 %v713_v54, %v637_v49  ;;  %v135_v56 = vpop.f32.mrb[3].mxu0  ;;  %v197_v58 = vmax.f32 %v141_v51, 0.0 }
  0xe5   :  { %v136_v57 = vadd.f32 %v637_v49, %v135_v56  ;;  %v195_v60 = vmax.f32 %v133_v53, 0.0 }
  0xe6   :  { %v198_v59 = vmax.f32 %v144_v55, 0.0 }
  0xe7   :  { %v196_v61 = vmax.f32 %v136_v57, 0.0 }
  0xe8   :  { %v212_v62 = vpack.c.bf16 %v198_v59, %v197_v58 }
  0xe9   :  { %v716_v63 = vpop.f32.mrb[4].mxu0  ;;  %v211_v0 = vpack.c.bf16 %v196_v61, %v195_v60 }
  0xea   :  { %v157_v1 = vadd.f32 %v716_v63, %v637_v49  ;;  %v148_v2 = vpop.f32.mrb[5].mxu0 }
  0xeb   :  { %v149_v3 = vadd.f32 %v637_v49, %v148_v2  ;;  %v717_v4 = vpop.f32.mrb[6].mxu0  ;;  %734 = vmatprep.mubr.msk.bf16.mxu1 %vm238_vm1, %v211_v0 }
  0xec   :  { %v201_v5 = vmax.f32 %v157_v1, 0.0  ;;  %v160_v6 = vadd.f32 %v717_v4, %v637_v49  ;;  %v151_v7 = vpop.f32.mrb[7].mxu0  ;;  %735 = vmatmul.mubr.msk.bf16.vlgmr.msra.gmra.mrb[0].mxu1 %vm238_vm1, %v212_v62 }
  0xed   :  { %v199_v8 = vmax.f32 %v149_v3, 0.0  ;;  %v152_v9 = vadd.f32 %v637_v49, %v151_v7 }
  0xee   :  { %v202_v10 = vmax.f32 %v160_v6, 0.0 }
  0xef   :  { %v200_v11 = vmax.f32 %v152_v9, 0.0 }
  0xf0   :  { %v214_v12 = vpack.c.bf16 %v202_v10, %v201_v5 }
  0xf1   :  { %v213_v13 = vpack.c.bf16 %v200_v11, %v199_v8  ;;  %v720_v14 = vpop.f32.mrb[8].mxu0 }
  0xf2   :  { %v173_v15 = vadd.f32 %v720_v14, %v637_v49  ;;  %v164_v16 = vpop.f32.mrb[9].mxu0 }
  0xf3   :  { %738 = vmatprep.mubr.msk.bf16.mxu1 %vm238_vm1, %v213_v13  ;;  %v165_v17 = vadd.f32 %v637_v49, %v164_v16  ;;  %v721_v18 = vpop.f32.mrb[10].mxu0 }
  0xf4   :  { %739 = vmatmul.mubr.msk.bf16.gmra.mrb[4].mxu1 %vm238_vm1, %v214_v12  ;;  %v205_v19 = vmax.f32 %v173_v15, 0.0  ;;  %v176_v20 = vadd.f32 %v721_v18, %v637_v49  ;;  %v167_v21 = vpop.f32.mrb[11].mxu0 }
  0xf5   :  { %v203_v22 = vmax.f32 %v165_v17, 0.0  ;;  %v168_v23 = vadd.f32 %v637_v49, %v167_v21 }
  0xf6   :  { %v206_v24 = vmax.f32 %v176_v20, 0.0 }
  0xf7   :  { %v204_v25 = vmax.f32 %v168_v23, 0.0 }
  0xf8   :  { %v216_v26 = vpack.c.bf16 %v206_v24, %v205_v19 }
  0xf9   :  { %v215_v27 = vpack.c.bf16 %v204_v25, %v203_v22  ;;  %v724_v28 = vpop.f32.mrb[12].mxu0 }
  0xfa   :  { %v189_v29 = vadd.f32 %v724_v28, %v637_v49  ;;  %v180_v30 = vpop.f32.mrb[13].mxu0 }
  0xfb   :  { %742 = vmatprep.mubr.msk.bf16.mxu1 %vm238_vm1, %v215_v27  ;;  %v181_v31 = vadd.f32 %v637_v49, %v180_v30  ;;  %v725_v32 = vpop.f32.mrb[14].mxu0 }
  0xfc   :  { %743 = vmatmul.mubr.msk.bf16.gmra.mrb[8].mxu1 %vm238_vm1, %v216_v26  ;;  %v209_v33 = vmax.f32 %v189_v29, 0.0  ;;  %v192_v34 = vadd.f32 %v725_v32, %v637_v49  ;;  %v183_v35 = vpop.f32.mrb[15].mxu0 }
  0xfd   :  { %v207_v36 = vmax.f32 %v181_v31, 0.0  ;;  %v184_v37 = vadd.f32 %v637_v49, %v183_v35  ;;  %v819_v35 = vmov 0.0  }
  0xfe   :  { %v210_v38 = vmax.f32 %v192_v34, 0.0  ;;  %770 = vmatprep.subr.bf16.mxu1 %v819_v35 }
  0xff   :  { %v208_v39 = vmax.f32 %v184_v37, 0.0  ;;  %v821_v37 = vmov 0  }
 0x100   :  { %v218_v40 = vpack.c.bf16 %v210_v38, %v209_v33  ;;  %794 = vset.pattern.permute.xlu0 %v821_v37  ;;  %v655_v38 = vld [vmem:[%s1044_s6] ss:$0 sm:$0xff] }
 0x101   :  { %v217_v41 = vpack.c.bf16 %v208_v39, %v207_v36  ;;  %v544_v36 = vld [vmem:[#allocation2] sm:$0x1] }
 0x102   :  { %547 = vperm.xlu0 %794, %v544_v36  }
 0x103   :  { %746 = vmatprep.mubr.msk.bf16.mxu1 %vm238_vm1, %v217_v41 }
 0x104   :  { %747 = vmatmul.mubr.msk.bf16.gmra.mrb[12].mxu1 %vm238_vm1, %v218_v40 }
 0x105   :  { %786 = vmatprep.mubr.msk.bf16.mxu1 %vm820_vm2, %v819_v35 }
 0x1bf   :  { %v736_v43 = vpop.f32.mrb[0].mxu1 }
 0x1c0   :  { %v306_v44 = vadd.f32 %v736_v43, %v646_v42  ;;  %v297_v45 = vpop.f32.mrb[1].mxu1 }
 0x1c1   :  { %v298_v46 = vadd.f32 %v646_v42, %v297_v45  ;;  %v737_v47 = vpop.f32.mrb[2].mxu1 }
 0x1c2   :  { %v309_v48 = vadd.f32 %v737_v47, %v646_v42  ;;  %v300_v50 = vpop.f32.mrb[3].mxu1  ;;  %v362_v51 = vmax.f32 %v306_v44, 0.0 }
 0x1c3   :  { %v301_v49 = vadd.f32 %v646_v42, %v300_v50  ;;  %v360_v53 = vmax.f32 %v298_v46, 0.0 }
 0x1c4   :  { %v363_v52 = vmax.f32 %v309_v48, 0.0 }
 0x1c5   :  { %v361_v54 = vmax.f32 %v301_v49, 0.0 }
 0x1c6   :  { %v377_v55 = vpack.c.bf16 %v363_v52, %v362_v51 }
 0x1c7   :  { %v376_v56 = vpack.c.bf16 %v361_v54, %v360_v53  ;;  %v740_v57 = vpop.f32.mrb[4].mxu1 }
 0x1c8   :  { %v322_v58 = vadd.f32 %v740_v57, %v646_v42  ;;  %v313_v59 = vpop.f32.mrb[5].mxu1 }
 0x1c9   :  { %v314_v60 = vadd.f32 %v646_v42, %v313_v59  ;;  %v741_v61 = vpop.f32.mrb[6].mxu1  ;;  %754 = vmatprep.mubr.msk.bf16.mxu0 %vm73_vm0, %v376_v56 }
 0x1ca   :  { %v366_v62 = vmax.f32 %v322_v58, 0.0  ;;  %v325_v63 = vadd.f32 %v741_v61, %v646_v42  ;;  %v316_v0 = vpop.f32.mrb[7].mxu1  ;;  %755 = vmatmul.mubr.msk.bf16.vlgmr.msra.gmra.mrb[16].mxu0 %vm73_vm0, %v377_v55 }
 0x1cb   :  { %v364_v1 = vmax.f32 %v314_v60, 0.0  ;;  %v317_v2 = vadd.f32 %v646_v42, %v316_v0 }
 0x1cc   :  { %v367_v3 = vmax.f32 %v325_v63, 0.0 }
 0x1cd   :  { %v365_v4 = vmax.f32 %v317_v2, 0.0 }
 0x1ce   :  { %v379_v5 = vpack.c.bf16 %v367_v3, %v366_v62 }
 0x1cf   :  { %v378_v6 = vpack.c.bf16 %v365_v4, %v364_v1  ;;  %v744_v7 = vpop.f32.mrb[8].mxu1 }
 0x1d0   :  { %v338_v8 = vadd.f32 %v744_v7, %v646_v42  ;;  %v329_v9 = vpop.f32.mrb[9].mxu1 }
 0x1d1   :  { %758 = vmatprep.mubr.msk.bf16.mxu0 %vm73_vm0, %v378_v6  ;;  %v330_v10 = vadd.f32 %v646_v42, %v329_v9  ;;  %v745_v11 = vpop.f32.mrb[10].mxu1 }
 0x1d2   :  { %759 = vmatmul.mubr.msk.bf16.gmra.mrb[20].mxu0 %vm73_vm0, %v379_v5  ;;  %v370_v12 = vmax.f32 %v338_v8, 0.0  ;;  %v341_v13 = vadd.f32 %v745_v11, %v646_v42  ;;  %v332_v14 = vpop.f32.mrb[11].mxu1 }
 0x1d3   :  { %v368_v15 = vmax.f32 %v330_v10, 0.0  ;;  %v333_v16 = vadd.f32 %v646_v42, %v332_v14 }
 0x1d4   :  { %v371_v17 = vmax.f32 %v341_v13, 0.0 }
 0x1d5   :  { %v369_v18 = vmax.f32 %v333_v16, 0.0 }
 0x1d6   :  { %v381_v19 = vpack.c.bf16 %v371_v17, %v370_v12 }
 0x1d7   :  { %v380_v20 = vpack.c.bf16 %v369_v18, %v368_v15  ;;  %v748_v21 = vpop.f32.mrb[12].mxu1 }
 0x1d8   :  { %v354_v22 = vadd.f32 %v748_v21, %v646_v42  ;;  %v345_v23 = vpop.f32.mrb[13].mxu1 }
 0x1d9   :  { %762 = vmatprep.mubr.msk.bf16.mxu0 %vm73_vm0, %v380_v20  ;;  %v346_v24 = vadd.f32 %v646_v42, %v345_v23  ;;  %v749_v25 = vpop.f32.mrb[14].mxu1 }
 0x1da   :  { %763 = vmatmul.mubr.msk.bf16.gmra.mrb[24].mxu0 %vm73_vm0, %v381_v19  ;;  %v374_v26 = vmax.f32 %v354_v22, 0.0  ;;  %v357_v27 = vadd.f32 %v749_v25, %v646_v42  ;;  %v348_v28 = vpop.f32.mrb[15].mxu1 }
 0x1db   :  { %v372_v29 = vmax.f32 %v346_v24, 0.0  ;;  %v349_v30 = vadd.f32 %v646_v42, %v348_v28 }
 0x1dc   :  { %v375_v31 = vmax.f32 %v357_v27, 0.0 }
 0x1dd   :  { %v373_v32 = vmax.f32 %v349_v30, 0.0 }
 0x1de   :  { %v383_v33 = vpack.c.bf16 %v375_v31, %v374_v26 }
 0x1df   :  { %v382_v34 = vpack.c.bf16 %v373_v32, %v372_v29 }
 0x1e1   :  { %766 = vmatprep.mubr.msk.bf16.mxu0 %vm73_vm0, %v382_v34 }
 0x1e2   :  { %767 = vmatmul.mubr.msk.bf16.gmra.mrb[28].mxu0 %vm73_vm0, %v383_v33 }
 0x29d   :  { %v756_v39 = vpop.f32.mrb[16].mxu0 }
 0x29e   :  { %v464_v40 = vadd.f32 %v756_v39, %v655_v38  ;;  %v455_v41 = vpop.f32.mrb[17].mxu0 }
 0x29f   :  { %v456_v42 = vadd.f32 %v655_v38, %v455_v41  ;;  %v757_v43 = vpop.f32.mrb[18].mxu0 }
 0x2a0   :  { %v467_v44 = vadd.f32 %v757_v43, %v655_v38  ;;  %v458_v45 = vpop.f32.mrb[19].mxu0  ;;  %v520_v47 = vmax.f32 %v464_v40, 0.0  ;;  %v542_v40 = vld [vmem:[%s1045_s7] sm:$0x1]  ;;  %s799_s7 = scalar_lea.vmem %s630_s30, 32 }
 0x2a1   :  { %v459_v46 = vadd.f32 %v655_v38, %v458_v45  ;;  %v518_v50 = vmax.f32 %v456_v42, 0.0  ;;  %v543_v41 = vpack.c.bf16 %v542_v40, %v542_v40  ;;  %v550_v42 = vlaneseq  ;;  %v548_v45 = vpop.permute.xlu0 %547  ;;  %p801_p2 = scmp.lt.s32.totalorder %s799_s7, %s795_s10 }
 0x2a2   :  { %v521_v48 = vmax.f32 %v467_v44, 0.0 }
 0x2a3   :  { %v519_v49 = vmax.f32 %v459_v46, 0.0  ;;  %v551_v43 = vshrl.u32 %v550_v42, 7  ;;  %p802_p3 = por %p801_p2, %p800_p1 }
 0x2a4   :  { %v535_v51 = vpack.c.bf16 %v521_v48, %v520_v47 }
 0x2a5   :  { %v534_v52 = vpack.c.bf16 %v519_v49, %v518_v50  ;;  %v760_v53 = vpop.f32.mrb[20].mxu0  ;;  %v552_v44 = vsub.s32 0, %v551_v43  ;;  %p803_p4 = pnand %p802_p3, %p796_p0 }
 0x2a6   :  { %v480_v54 = vadd.f32 %v760_v53, %v655_v38  ;;  %v471_v55 = vpop.f32.mrb[21].mxu0  ;;  %v562_v7 = vsel %vm554_vm3, %v535_v51, 0 }
 0x2a7   :  { %v472_v56 = vadd.f32 %v655_v38, %v471_v55  ;;  %v761_v57 = vpop.f32.mrb[22].mxu0  ;;  %v559_v58 = vsel %vm554_vm3, %v534_v52, 0  ;;  %v553_v46 = vrot.slane %v548_v45, %v552_v44 }
 0x2a8   :  { %v483_v59 = vadd.f32 %v761_v57, %v655_v38  ;;  %v474_v60 = vpop.f32.mrb[23].mxu0  ;;  %771 = vmatpush3.bf16.xpose.msra.mxu1 %v559_v58  ;;  %v524_v62 = vmax.f32 %v480_v54, 0.0 }
 0x2a9   :  { %v475_v61 = vadd.f32 %v655_v38, %v474_v60  ;;  %772 = vmatprep.subr.bf16.mxu1 %v819_v35  ;;  %v522_v0 = vmax.f32 %v472_v56, 0.0 }
 0x2aa   :  { %v525_v63 = vmax.f32 %v483_v59, 0.0 }
 0x2ab   :  { %v523_v1 = vmax.f32 %v475_v61, 0.0 }
 0x2ac   :  { %v537_v2 = vpack.c.bf16 %v525_v63, %v524_v62 }
 0x2ad   :  { %v536_v3 = vpack.c.bf16 %v523_v1, %v522_v0  ;;  %v764_v4 = vpop.f32.mrb[24].mxu0 }
 0x2ae   :  { %v496_v5 = vadd.f32 %v764_v4, %v655_v38  ;;  %v487_v6 = vpop.f32.mrb[25].mxu0  ;;  %v568_v34 = vsel %vm554_vm3, %v537_v2, 0 }
 0x2af   :  { %v488_v8 = vadd.f32 %v655_v38, %v487_v6  ;;  %v765_v9 = vpop.f32.mrb[26].mxu0  ;;  %v565_v22 = vsel %vm554_vm3, %v536_v3, 0 }
 0x2b0   :  { %773 = vmatpush3.bf16.xpose.msra.mxu1 %v562_v7  ;;  %v528_v10 = vmax.f32 %v496_v5, 0.0  ;;  %v499_v11 = vadd.f32 %v765_v9, %v655_v38  ;;  %v490_v12 = vpop.f32.mrb[27].mxu0 }
 0x2b1   :  { %v526_v13 = vmax.f32 %v488_v8, 0.0  ;;  %v491_v14 = vadd.f32 %v655_v38, %v490_v12  ;;  %774 = vmatprep.subr.bf16.mxu1 %v819_v35 }
 0x2b2   :  { %v529_v15 = vmax.f32 %v499_v11, 0.0 }
 0x2b3   :  { %v527_v16 = vmax.f32 %v491_v14, 0.0 }
 0x2b4   :  { %v539_v17 = vpack.c.bf16 %v529_v15, %v528_v10 }
 0x2b5   :  { %v538_v18 = vpack.c.bf16 %v527_v16, %v526_v13  ;;  %v768_v19 = vpop.f32.mrb[28].mxu0 }
 0x2b6   :  { %v512_v20 = vadd.f32 %v768_v19, %v655_v38  ;;  %v503_v21 = vpop.f32.mrb[29].mxu0  ;;  %v574_v37 = vsel %vm554_vm3, %v539_v17, 0 }
 0x2b7   :  { %v504_v23 = vadd.f32 %v655_v38, %v503_v21  ;;  %v769_v24 = vpop.f32.mrb[30].mxu0  ;;  %v571_v36 = vsel %vm554_vm3, %v538_v18, 0 }
 0x2b8   :  { %775 = vmatpush3.bf16.xpose.msra.mxu1 %v565_v22  ;;  %v532_v25 = vmax.f32 %v512_v20, 0.0  ;;  %v515_v26 = vadd.f32 %v769_v24, %v655_v38  ;;  %v506_v27 = vpop.f32.mrb[31].mxu0 }
 0x2b9   :  { %776 = vmatprep.subr.bf16.mxu1 %v819_v35  ;;  %v530_v28 = vmax.f32 %v504_v23, 0.0  ;;  %v507_v29 = vadd.f32 %v655_v38, %v506_v27 }
 0x2ba   :  { %v533_v30 = vmax.f32 %v515_v26, 0.0 }
 0x2bb   :  { %v531_v31 = vmax.f32 %v507_v29, 0.0 }
 0x2bc   :  { %v541_v32 = vpack.c.bf16 %v533_v30, %v532_v25 }
 0x2bd   :  { %v540_v33 = vpack.c.bf16 %v531_v31, %v530_v28 }
 0x2be   :  { %v580_v39 = vsel %vm554_vm3, %v541_v32, 0 }
 0x2bf   :  { %v577_v38 = vsel %vm554_vm3, %v540_v33, 0 }
 0x2c0   :  { %777 = vmatpush3.bf16.xpose.msra.mxu1 %v568_v34 }
 0x2c1   :  { %778 = vmatprep.subr.bf16.mxu1 %v819_v35 }
 0x2c8   :  { %779 = vmatpush3.bf16.xpose.msra.mxu1 %v571_v36 }
 0x2c9   :  { %780 = vmatprep.subr.bf16.mxu1 %v819_v35 }
 0x2d0   :  { %781 = vmatpush3.bf16.xpose.msra.mxu1 %v574_v37 }
 0x2d1   :  { %782 = vmatprep.subr.bf16.mxu1 %v819_v35 }
 0x2d8   :  { %783 = vmatpush3.bf16.xpose.msra.mxu1 %v577_v38 }
 0x2d9   :  { %784 = vmatprep.subr.bf16.mxu1 %v819_v35 }
 0x2e0   :  { %785 = vmatpush3.bf16.xpose.msra.mxu1 %v580_v39 }
 0x2e7   :  { %787 = vmatmul.mubr.msk.bf16.vlgmr.msra.gmra.mrb[16].mxu1 %vm554_vm3, %v543_v41 }
 0x3ba   :  { %v616_v47 = vpop.f32.mrb[16].mxu1 }
 0x3bb   :  { %v617_v48 = vadd.f32 %v616_v47, %v553_v46  ;;  %v788_v35 = vpop.f32.mrb[17].mxu1 }
 0x3bc   :  { %v619_v50 = vpop.f32.mrb[18].mxu1 }
 0x3bd   :  { %622 = vst [vmem:[#allocation3] sm:$0x1] %v617_v48  ;;  %v789_v49 = vpop.f32.mrb[19].mxu1 }
 0x3be   :  { %806 = shalt.err (!%p803_p4)
}
 0x3bf   :  { %s807_s13 = scalar_lea.hbm %s1047_s9, 16 }
 0x3c0   :  { %p808_p5 = scmp.ne.s32.totalorder %s1047_s9, %s807_s13  ;;  %p811_p6 = scmp.lt.u32.totalorder %s807_s13, %s1047_s9 }
 0x3c2   :  { %p813_p7 = pnand %p811_p6, %p808_p5 }
 0x3c4   :  { %816 = shalt.err (!%p813_p7)
}
 0x3c5   :  { %632 = dma.vmem_to_hbm [thread:$0]  %s630_s30, 16, %s1047_s9, [#allocation4]  }
 0x3c6   :  { %817 = dma.done.wait [#allocation4], 16  }
 0x3c7   :  { %818 = vsyncadd [#allocation4], 4294967280 }
 0x3c8   :  { %636 = vsyncpa [#allocation4], 1 }

</bundles_post_ra>
